<compile_context>
chip_gen: v6e
topology: v6e:2x2x1
jax: 0.10.0
libtpu: 0.0.40
codegen_flags: <defaults>
</compile_context>

<pallas_src>
import functools
import math

import jax
import jax.numpy as jnp
from jax.experimental import pallas as pl
from jax.experimental.pallas import tpu as pltpu

EPS = 1e-5  # nn.InstanceNorm2d default (affine=False -> no scale/shift)


@functools.lru_cache(maxsize=None)
def _roll_matches_jnp():
    """Tiny one-time probe: calibrate pltpu.roll's rotation direction so the
    shift construction below is robust across Pallas versions."""
    def k(x_ref, o_ref):
        o_ref[...] = pltpu.roll(x_ref[...], shift=1, axis=0)

    x = jax.lax.broadcasted_iota(jnp.float32, (8, 128), 0)
    y = pl.pallas_call(k, out_shape=jax.ShapeDtypeStruct((8, 128), jnp.float32))(x)
    # jnp.roll convention: out[i] = x[(i - shift) % n]  ->  out[0] == 7
    return bool(y[0, 0] == 7.0)


def _shifted(x2, s, roll_like_jnp):
    """out[i] = x2[(i + s) mod M] along the flattened-spatial (sublane) axis."""
    M = x2.shape[0]
    if s % M == 0:
        return x2
    shift = (-s) % M if roll_like_jnp else s % M
    return pltpu.roll(x2, shift=shift, axis=0)


def _conv3x3_flat(x2, w_ref, b_ref, H, W, roll_like_jnp):
    """3x3, stride-1, pad-1 conv on flattened-spatial activations.

    x2:    (H*W, Cin)   f32
    w_ref: (9*Cin, Cout) bf16 ref, rows ordered (kh, kw, cin)
    b_ref: (1, Cout)    f32 ref
    returns (H*W, Cout) f32
    """
    M, Cin = x2.shape
    Cout = w_ref.shape[-1]
    idx = jax.lax.broadcasted_iota(jnp.int32, (M, 1), 0)
    row = idx // W
    col = idx % W

    taps = []
    for kh in range(3):
        for kw in range(3):
            dh, dw = kh - 1, kw - 1
            t = _shifted(x2, dh * W + dw, roll_like_jnp)
            valid = ((row + dh >= 0) & (row + dh < H) &
                     (col + dw >= 0) & (col + dw < W))
            taps.append(jnp.where(valid, t, 0.0).astype(jnp.bfloat16))

    if Cin % 128 == 0:
        # Full im2col: lane-aligned concat + a single wide-K MXU matmul.
        patch = jnp.concatenate(taps, axis=-1)                   # (M, 9*Cin) bf16
        out = jnp.dot(patch, w_ref[...], preferred_element_type=jnp.float32)
        return out + b_ref[...]

    # Cin == 64: 64-lane taps are not 128-aligned, so skip the lane concat and
    # accumulate 9 small matmuls (bias folded into the accumulator init).
    acc = jnp.broadcast_to(b_ref[...], (M, Cout)).astype(jnp.float32)
    for i, tap in enumerate(taps):
        acc = acc + jnp.dot(tap, w_ref[i * Cin:(i + 1) * Cin, :],
                            preferred_element_type=jnp.float32)
    return acc


def _instance_norm_relu(y):
    """Per-channel instance norm over the flattened spatial axis, then ReLU."""
    m = y.shape[0]
    s1 = jnp.sum(y, axis=0, keepdims=True)
    s2 = jnp.sum(y * y, axis=0, keepdims=True)
    mean = s1 / m
    var = s2 / m - mean * mean                      # one-pass biased variance
    yn = (y - mean) * jax.lax.rsqrt(var + EPS)
    return jnp.maximum(yn, 0.0)


def down_convolution(x, w1a, b1a, w1b, b1b, w2a, b2a, w2b, b2b):
    """Pallas TPU DownConvlution.forward.

    x: (N, H, W, 64) f32 (NHWC), H and W multiples of 4.
    wXy: (3, 3, Cin, Cout) HWIO conv weights; bXy: (Cout,) biases.
    returns (N, H//4, W//4, 256) f32.
    """
    N, H, W, Cin0 = x.shape
    assert Cin0 == 64 and H % 4 == 0 and W % 4 == 0
    H1, W1 = H // 2, W // 2
    H2, W2 = H1 // 2, W1 // 2
    M0, M1, M2 = H * W, H1 * W1, H2 * W2
    C1, C2 = w1a.shape[-1], w2a.shape[-1]          # 128, 256
    roll_like_jnp = _roll_matches_jnp()

    def slab(w):
        kh, kw, ci, co = w.shape
        return w.reshape(kh * kw * ci, co).astype(jnp.bfloat16)

    def decimation(hin, win):
        # 0/1 selection matrix so that (S @ full)[oh*ow_ + ow] == full[2*oh, 2*ow]
        # (== the stride-2 conv output).  Precomputed on host, bf16 exact.
        oh, ow = hin // 2, win // 2
        j = jnp.arange(oh * ow)
        src = (2 * (j // ow)) * win + 2 * (j % ow)
        return (src[:, None] == jnp.arange(hin * win)[None, :]).astype(jnp.bfloat16)

    def kernel(x_ref, w1a_ref, b1a_ref, w1b_ref, b1b_ref,
               w2a_ref, b2a_ref, w2b_ref, b2b_ref, s1_ref, s2_ref, o_ref):
        xf = x_ref[0].astype(jnp.float32)                                 # (M0, 64)
        # --- layers_1: stride-2 conv == full-res stride-1 conv + decimation matmul
        f1 = _conv3x3_flat(xf, w1a_ref, b1a_ref, H, W, roll_like_jnp)     # (M0, C1)
        y = jnp.dot(s1_ref[...], f1.astype(jnp.bfloat16),
                    preferred_element_type=jnp.float32)                   # (M1, C1)
        y = _conv3x3_flat(y, w1b_ref, b1b_ref, H1, W1, roll_like_jnp)     # (M1, C1)
        y = _instance_norm_relu(y)
        # --- layers_2
        f2 = _conv3x3_flat(y, w2a_ref, b2a_ref, H1, W1, roll_like_jnp)    # (M1, C2)
        z = jnp.dot(s2_ref[...], f2.astype(jnp.bfloat16),
                    preferred_element_type=jnp.float32)                   # (M2, C2)
        z = _conv3x3_flat(z, w2b_ref, b2b_ref, H2, W2, roll_like_jnp)     # (M2, C2)
        z = _instance_norm_relu(z)
        o_ref[0] = z.astype(o_ref.dtype)

    const = lambda n: (0, 0)
    out_flat = pl.pallas_call(
        kernel,
        out_shape=jax.ShapeDtypeStruct((N, M2, C2), x.dtype),
        grid_spec=pltpu.PrefetchScalarGridSpec(
            num_scalar_prefetch=0,
            grid=(N,),
            in_specs=[
                pl.BlockSpec((1, M0, Cin0), lambda n: (n, 0, 0)),
                pl.BlockSpec((9 * Cin0, C1), const),
                pl.BlockSpec((1, C1), const),
                pl.BlockSpec((9 * C1, C1), const),
                pl.BlockSpec((1, C1), const),
                pl.BlockSpec((9 * C1, C2), const),
                pl.BlockSpec((1, C2), const),
                pl.BlockSpec((9 * C2, C2), const),
                pl.BlockSpec((1, C2), const),
                pl.BlockSpec((M1, M0), const),
                pl.BlockSpec((M2, M1), const),
            ],
            out_specs=pl.BlockSpec((1, M2, C2), lambda n: (n, 0, 0)),
        ),
        compiler_params=pltpu.CompilerParams(
            dimension_semantics=("parallel",),   # v7x: one sample per TensorCore
            vmem_limit_bytes=32 << 20,           # working set ~7 MiB; v7x has 64 MiB/TC
        ),
    )(
        x.reshape(N, M0, Cin0),
        slab(w1a), b1a.reshape(1, C1),
        slab(w1b), b1b.reshape(1, C1),
        slab(w2a), b2a.reshape(1, C2),
        slab(w2b), b2b.reshape(1, C2),
        decimation(H, W), decimation(H1, W1),
    )
    return out_flat.reshape(N, H2, W2, C2)


def down_convolution_ref(x, w1a, b1a, w1b, b1b, w2a, b2a, w2b, b2b):
    """Pure-JAX f32 reference (same NHWC / HWIO layout, PyTorch padding=1)."""
    def conv(h, w, b, stride):
        y = jax.lax.conv_general_dilated(
            h, w, window_strides=(stride, stride), padding=((1, 1), (1, 1)),
            dimension_numbers=("NHWC", "HWIO", "NHWC"))
        return y + b[None, None, None, :]

    def inorm_relu(y):
        mean = jnp.mean(y, axis=(1, 2), keepdims=True)
        var = jnp.mean((y - mean) ** 2, axis=(1, 2), keepdims=True)
        return jnp.maximum((y - mean) * jax.lax.rsqrt(var + EPS), 0.0)

    h = conv(x, w1a, b1a, 2)
    h = conv(h, w1b, b1b, 1)
    h = inorm_relu(h)
    h = conv(h, w2a, b2a, 2)
    h = conv(h, w2b, b2b, 1)
    return inorm_relu(h)


if __name__ == "__main__":
    N, H, W = 2, 16, 16

    key = jax.random.PRNGKey(0)
    ks = jax.random.split(key, 9)

    def conv_params(kw_key, kb_key, cin, cout):
        std = math.sqrt(2.0 / (3 * 3 * cout))            # initial(): N(0, sqrt(2/(k*k*Cout)))
        bound = 1.0 / math.sqrt(cin * 3 * 3)             # PyTorch default bias init
        w = std * jax.random.normal(kw_key, (3, 3, cin, cout), jnp.float32)
        b = jax.random.uniform(kb_key, (cout,), jnp.float32, -bound, bound)
        return w, b

    x = jax.random.normal(ks[0], (N, H, W, 64), jnp.float32)
    w1a, b1a = conv_params(ks[1], ks[2], 64, 128)
    w1b, b1b = conv_params(ks[3], ks[4], 128, 128)
    w2a, b2a = conv_params(ks[5], ks[6], 128, 256)
    w2b, b2b = conv_params(ks[7], ks[8], 256, 256)

    out = down_convolution(x, w1a, b1a, w1b, b1b, w2a, b2a, w2b, b2b)
    out = jax.block_until_ready(out)

    ref = down_convolution_ref(x, w1a, b1a, w1b, b1b, w2a, b2a, w2b, b2b)
    assert out.shape == (N, H // 4, W // 4, 256)
    max_err = float(jnp.max(jnp.abs(out - ref)))
    if not bool(jnp.allclose(out, ref, atol=5e-2, rtol=5e-2)):
        raise AssertionError(f"Pallas kernel mismatch vs reference, max abs err = {max_err}")

    print("KERNEL_OK")
</pallas_src>

<mosaic_0001>
module attributes {stable_mosaic.version = 11 : i64} {
  func.func @k(%arg0: memref<8x128xf32, #tpu.memory_space<vmem>>, %arg1: memref<8x128xf32, #tpu.memory_space<vmem>>) attributes {dimension_semantics = [], scalar_prefetch = 0 : i64, scratch_operands = 0 : i64, tpu.core_type = #tpu.core_type<tc>} {
    %c0 = arith.constant 0 : index
    %c0_0 = arith.constant 0 : index
    %0 = vector.load %arg0[%c0, %c0_0] : memref<8x128xf32, #tpu.memory_space<vmem>>, vector<8x128xf32>
    %c1_i32 = arith.constant 1 : i32
    %1 = tpu.dynamic_rotate %0 by %c1_i32 dim 0 : vector<8x128xf32>, i32 -> vector<8x128xf32>
    %c0_1 = arith.constant 0 : index
    %c0_2 = arith.constant 0 : index
    %2 = vector.load %arg1[%c0_1, %c0_2] : memref<8x128xf32, #tpu.memory_space<vmem>>, vector<8x128xf32>
    tpu.vector_store %arg1[%c0_1, %c0_2], %1 {strides = array<i32>} : memref<8x128xf32, #tpu.memory_space<vmem>>, vector<8x128xf32>,
    return
  }
}

</mosaic_0001>

<bundles_post_ra>
// kernel: tpu_custom_call.1
= control target key start
LH: loop header
LB: loop body
LE: loop exit
PB: predicated region body
PF: predicated region fallthrough
CT: control target
= control target key end

     0   :  { %6 = vsyncpa [#allocation3], 0  ;;  %s103_s0 = inlined_call_operand.hbm [shape: f32[8,128], index: 0, kind: input, shape index: {}]   ;;  %s104_s1 = inlined_call_operand.hbm [shape: f32[8,128], index: 1, kind: output, shape index: {}]  }
   0x1   :  { %7 = vsyncpa [#allocation4], 0  ;;  %s85_s6 = smov [#allocation2]  }
   0x2   :  { %s14_s7 = sshll.u32 %s85_s6, 4  ;;  %s15_s7 = int_to_ptr.vmem [resolvable:$true] %s14_s7 }
   0x3   :  { %s49_s8 = scalar_lea.vmem %s15_s7, 128  ;;  %p54_p1 = scmp.lt.s32.totalorder %s15_s7, %s15_s7 }
   0x4   :  { %p50_p0 = scmp.ne.s32.totalorder %s15_s7, %s49_s8  ;;  %p55_p2 = scmp.lt.s32.totalorder %s49_s8, %s49_s8 }
   0x6   :  { %p56_p3 = por %p55_p2, %p54_p1 }
   0x8   :  { %p57_p4 = pnand %p56_p3, %p50_p0 }
   0xa   :  { %60 = shalt.err (!%p57_p4)
}
   0xb   :  { %17 = dma.hbm_to_vmem [thread:$0]  %s103_s0, 128, %s15_s7, [#allocation3]  }
   0xc   :  { %81 = dma.done.wait [#allocation3], 128  }
   0xd   :  { %82 = vsyncadd [#allocation3], 4294967168  ;;  %s86_s11 = smov [#allocation5]   ;;  %v21_v0 = vld [vmem:[#allocation2] sm:$0xff] }
   0xe   :  { %s30_s12 = sshll.u32 %s86_s11, 4  ;;  %v22_v1 = vrot.slane %v21_v0, 7  ;;  %s31_s12 = int_to_ptr.vmem [resolvable:$true] %s30_s12 }
   0xf   :  { %s61_s13 = scalar_lea.vmem %s31_s12, 128  ;;  %p66_p6 = scmp.lt.s32.totalorder %s31_s12, %s31_s12 }
  0x10   :  { %23 = vst [vmem:[#allocation5] sm:$0xff] %v22_v1  ;;  %p62_p5 = scmp.ne.s32.totalorder %s31_s12, %s61_s13  ;;  %p67_p7 = scmp.lt.s32.totalorder %s61_s13, %s61_s13 }
  0x12   :  { %p68_p8 = por %p67_p7, %p66_p6 }
  0x14   :  { %p69_p9 = pnand %p68_p8, %p62_p5 }
  0x16   :  { %72 = shalt.err (!%p69_p9)
}
  0x17   :  { %33 = dma.vmem_to_hbm [thread:$0]  %s31_s12, 128, %s104_s1, [#allocation4]  }
  0x18   :  { %83 = dma.done.wait [#allocation4], 128  }
  0x19   :  { %84 = vsyncadd [#allocation4], 4294967168 }
  0x1a   :  { %37 = vsyncpa [#allocation3], 1 }
  0x1b   :  { %38 = vsyncpa [#allocation4], 1 }

</bundles_post_ra>
